<compile_context>
chip_gen: v6e
topology: v6e:2x2x1
jax: 0.10.0
libtpu: 0.0.40
codegen_flags: <defaults>
</compile_context>

<pallas_src>
import functools

import jax
import jax.numpy as jnp
from jax import lax
from jax.experimental import pallas as pl
from jax.experimental.pallas import tpu as pltpu


VMEM_LIMIT = 48 * 1024 * 1024   # above the 32 MiB scoped default, < v7x 64 MiB


def _cparams(*semantics):
    return pltpu.CompilerParams(dimension_semantics=tuple(semantics),
                                vmem_limit_bytes=VMEM_LIMIT)


def _pick_tile(dim, target, mult):
    # Largest `mult`-aligned divisor of `dim` that is <= target, else `dim`
    # (a full-extent block is always a legal BlockSpec).
    if dim <= target:
        return dim
    t = (target // mult) * mult
    while t >= mult:
        if dim % t == 0:
            return t
        t -= mult
    return dim


# ----------------------------------------------------------------------------
# Tiled matmul with fused epilogue (scale / bias / ReLU / residual add)
# ----------------------------------------------------------------------------

def _matmul_kernel(*args, relu, has_scale, has_bias, fuse_add):
    n_in = 2 + int(fuse_add) + int(has_scale) + int(has_bias)
    in_refs = args[:n_in]
    o_ref, acc_ref = args[n_in], args[n_in + 1]

    idx = 0
    x_ref = in_refs[idx]; idx += 1
    x2_ref = None
    if fuse_add:
        x2_ref = in_refs[idx]; idx += 1
    w_ref = in_refs[idx]; idx += 1
    scale_ref = bias_ref = None
    if has_scale:
        scale_ref = in_refs[idx]; idx += 1
    if has_bias:
        bias_ref = in_refs[idx]; idx += 1

    k = pl.program_id(2)

    @pl.when(k == 0)
    def _():
        acc_ref[...] = jnp.zeros_like(acc_ref)

    x = x_ref[...]
    if fuse_add:
        x = x + x2_ref[...]
    acc_ref[...] += jnp.dot(x, w_ref[...], preferred_element_type=jnp.float32)

    @pl.when(k == pl.num_programs(2) - 1)
    def _():
        y = acc_ref[...]
        if has_scale:
            y = y * scale_ref[...]
        if has_bias:
            y = y + bias_ref[...]
        if relu:
            y = jnp.maximum(y, 0.0)
        o_ref[...] = y.astype(o_ref.dtype)


def matmul_tiled(x, w, scale=None, bias=None, relu=False, x2=None,
                 out_dtype=jnp.float32, pad_lanes=False,
                 tm_target=256, tn_target=512, tk_target=512):
    # y = epilogue((x [+ x2]) @ w);  scale/bias are (1, N) f32.
    M, K = x.shape
    _, N = w.shape
    n_out = N
    if pad_lanes and N % 128 != 0:
        # Lane-dense stores: pad N up to a multiple of 128, slice outside.
        n_pad = ((N + 127) // 128) * 128 - N
        w = jnp.pad(w, ((0, 0), (0, n_pad)))
        if scale is not None:
            scale = jnp.pad(scale, ((0, 0), (0, n_pad)))
        if bias is not None:
            bias = jnp.pad(bias, ((0, 0), (0, n_pad)))
        N = N + n_pad

    tm = _pick_tile(M, tm_target, 8)
    tn = _pick_tile(N, tn_target, 128)
    tk = _pick_tile(K, tk_target, 128)

    has_scale = scale is not None
    has_bias = bias is not None
    fuse_add = x2 is not None

    inputs = [x]
    in_specs = [pl.BlockSpec((tm, tk), lambda i, j, k: (i, k))]
    if fuse_add:
        inputs.append(x2)
        in_specs.append(pl.BlockSpec((tm, tk), lambda i, j, k: (i, k)))
    inputs.append(w)
    in_specs.append(pl.BlockSpec((tk, tn), lambda i, j, k: (k, j)))
    if has_scale:
        inputs.append(scale)
        in_specs.append(pl.BlockSpec((1, tn), lambda i, j, k: (0, j)))
    if has_bias:
        inputs.append(bias)
        in_specs.append(pl.BlockSpec((1, tn), lambda i, j, k: (0, j)))

    kernel = functools.partial(_matmul_kernel, relu=relu, has_scale=has_scale,
                               has_bias=has_bias, fuse_add=fuse_add)
    out = pl.pallas_call(
        kernel,
        out_shape=jax.ShapeDtypeStruct((M, N), out_dtype),
        grid=(M // tm, N // tn, K // tk),
        in_specs=in_specs,
        out_specs=pl.BlockSpec((tm, tn), lambda i, j, k: (i, j)),
        scratch_shapes=[pltpu.VMEM((tm, tn), jnp.float32)],
        compiler_params=_cparams("parallel", "parallel", "arbitrary"),
    )(*inputs)
    if n_out != N:
        out = out[:, :n_out]
    return out


# ----------------------------------------------------------------------------
# 3x3 conv + folded BatchNorm + ReLU (no HBM im2col; 9 shifted matmuls)
# ----------------------------------------------------------------------------

def _conv3x3_kernel(x_ref, w_ref, scale_ref, bias_ref, o_ref, acc_ref):
    k = pl.program_id(2)

    @pl.when(k == 0)
    def _():
        acc_ref[...] = jnp.zeros_like(acc_ref)

    xp = x_ref[0]                       # (H+2, W+2, tcin) bf16
    H = o_ref.shape[1]
    W = o_ref.shape[2]
    acc = acc_ref[...]
    for kh in range(3):
        for kw in range(3):
            patch = xp[kh:kh + H, kw:kw + W, :].reshape(H * W, xp.shape[-1])
            acc = acc + jnp.dot(patch, w_ref[kh, kw],
                                preferred_element_type=jnp.float32)
    acc_ref[...] = acc

    @pl.when(k == pl.num_programs(2) - 1)
    def _():
        y = acc_ref[...] * scale_ref[...] + bias_ref[...]
        y = jnp.maximum(y, 0.0)
        o_ref[0] = y.reshape(H, W, y.shape[-1]).astype(o_ref.dtype)


def conv3x3_bn_relu(x_nhwc, w_oihw, bn, out_dtype=jnp.bfloat16):
    # Conv2d(3x3, pad=1, bias=False) + BatchNorm(eval) + ReLU, NHWC layout.
    # One padded image's spatial extent is held in VMEM per batch; Cin is the
    # tiled reduction axis, Cout the tiled parallel axis.
    B, H, W, Cin = x_nhwc.shape
    Cout = w_oihw.shape[0]
    scale, bias = _bn_fold(*bn)
    scale = scale[None, :].astype(jnp.float32)
    bias = bias[None, :].astype(jnp.float32)

    xp = jnp.pad(x_nhwc.astype(jnp.bfloat16), ((0, 0), (1, 1), (1, 1), (0, 0)))
    wt = jnp.transpose(w_oihw, (2, 3, 1, 0)).astype(jnp.bfloat16)  # (3,3,Cin,Cout)

    tcin = _pick_tile(Cin, 256, 128)
    tcout = _pick_tile(Cout, 256, 128)

    return pl.pallas_call(
        _conv3x3_kernel,
        out_shape=jax.ShapeDtypeStruct((B, H, W, Cout), out_dtype),
        grid=(B, Cout // tcout, Cin // tcin),
        in_specs=[
            pl.BlockSpec((1, H + 2, W + 2, tcin), lambda b, j, k: (b, 0, 0, k)),
            pl.BlockSpec((3, 3, tcin, tcout), lambda b, j, k: (0, 0, k, j)),
            pl.BlockSpec((1, tcout), lambda b, j, k: (0, j)),
            pl.BlockSpec((1, tcout), lambda b, j, k: (0, j)),
        ],
        out_specs=pl.BlockSpec((1, H, W, tcout), lambda b, j, k: (b, 0, 0, j)),
        scratch_shapes=[pltpu.VMEM((H * W, tcout), jnp.float32)],
        compiler_params=_cparams("parallel", "parallel", "arbitrary"),
    )(xp, wt, scale, bias)


# ----------------------------------------------------------------------------
# PAM (position attention), flash-style tiling with online softmax
# ----------------------------------------------------------------------------

def _pam_flash_kernel(gamma_ref, q_ref, k_ref, v_ref, x_ref, o_ref,
                      m_scr, l_scr, acc_scr):
    j = pl.program_id(2)

    @pl.when(j == 0)
    def _():
        m_scr[...] = jnp.full_like(m_scr, -jnp.inf)
        l_scr[...] = jnp.zeros_like(l_scr)
        acc_scr[...] = jnp.zeros_like(acc_scr)

    q = q_ref[0]                      # (tq, Cq)
    k = k_ref[0]                      # (tkv, Cq)
    s = lax.dot_general(q, k, (((1,), (1,)), ((), ())),
                        preferred_element_type=jnp.float32)      # (tq, tkv)

    m_prev = m_scr[...]
    m_new = jnp.maximum(m_prev, jnp.max(s, axis=-1, keepdims=True))
    alpha = jnp.exp(m_prev - m_new)
    p = jnp.exp(s - m_new)
    l_scr[...] = alpha * l_scr[...] + jnp.sum(p, axis=-1, keepdims=True)
    acc_scr[...] = alpha * acc_scr[...] + jnp.dot(
        p.astype(v_ref.dtype), v_ref[0], preferred_element_type=jnp.float32)
    m_scr[...] = m_new

    @pl.when(j == pl.num_programs(2) - 1)
    def _():
        inv_l = pl.reciprocal(l_scr[...], approx=True)
        out = gamma_ref[0] * (acc_scr[...] * inv_l) + x_ref[0].astype(jnp.float32)
        o_ref[0] = out.astype(o_ref.dtype)


def pam_attention(q, k, v, x, gamma, out_dtype=jnp.bfloat16):
    # out = gamma * (softmax(Q K^T, -1) @ V) + X, all in (HW, C) layout.
    B, HW, Cq = q.shape
    C = v.shape[2]
    tq = _pick_tile(HW, 256, 8)
    tkv = _pick_tile(HW, 512, 8)
    return pl.pallas_call(
        _pam_flash_kernel,
        out_shape=jax.ShapeDtypeStruct((B, HW, C), out_dtype),
        grid=(B, HW // tq, HW // tkv),
        in_specs=[
            pl.BlockSpec(memory_space=pltpu.MemorySpace.SMEM),
            pl.BlockSpec((1, tq, Cq), lambda b, i, j: (b, i, 0)),
            pl.BlockSpec((1, tkv, Cq), lambda b, i, j: (b, j, 0)),
            pl.BlockSpec((1, tkv, C), lambda b, i, j: (b, j, 0)),
            pl.BlockSpec((1, tq, C), lambda b, i, j: (b, i, 0)),
        ],
        out_specs=pl.BlockSpec((1, tq, C), lambda b, i, j: (b, i, 0)),
        scratch_shapes=[pltpu.VMEM((tq, 1), jnp.float32),
                        pltpu.VMEM((tq, 1), jnp.float32),
                        pltpu.VMEM((tq, C), jnp.float32)],
        compiler_params=_cparams("parallel", "parallel", "arbitrary"),
    )(gamma, q, k, v, x)


# ----------------------------------------------------------------------------
# CAM (channel attention): tiled energy accumulation + tiled apply
# ----------------------------------------------------------------------------

def _cam_energy_kernel(x_ref, attn_ref, acc_ref):
    i = pl.program_id(1)

    @pl.when(i == 0)
    def _():
        acc_ref[...] = jnp.zeros_like(acc_ref)

    x = x_ref[0]                                             # (thw, C)
    acc_ref[...] += lax.dot_general(x, x, (((0,), (0,)), ((), ())),
                                    preferred_element_type=jnp.float32)  # (C, C)

    @pl.when(i == pl.num_programs(1) - 1)
    def _():
        e = acc_ref[...]
        e_new = jnp.max(e, axis=-1, keepdims=True) - e
        e_new = e_new - jnp.max(e_new, axis=-1, keepdims=True)
        p = jnp.exp(e_new)
        attn = p * pl.reciprocal(jnp.sum(p, axis=-1, keepdims=True), approx=True)
        attn_ref[0] = attn.astype(attn_ref.dtype)


def _cam_apply_kernel(gamma_ref, attn_ref, x_ref, o_ref):
    x = x_ref[0]                                             # (thw, C)
    attn = attn_ref[0]                                       # (C, C)
    out = lax.dot_general(x, attn, (((1,), (1,)), ((), ())),
                          preferred_element_type=jnp.float32)
    o_ref[0] = (gamma_ref[0] * out + x.astype(jnp.float32)).astype(o_ref.dtype)


def cam_module(x_flat, gamma, out_dtype=jnp.bfloat16):
    # x_flat: (B, HW, C).  energy = X^T X; attn = softmax(max(e)-e); out =
    # gamma * (X attn^T) + X.  Two passes so only HW tiles are resident.
    B, HW, C = x_flat.shape
    thw = _pick_tile(HW, 1024, 8)

    attn = pl.pallas_call(
        _cam_energy_kernel,
        out_shape=jax.ShapeDtypeStruct((B, C, C), jnp.bfloat16),
        grid=(B, HW // thw),
        in_specs=[pl.BlockSpec((1, thw, C), lambda b, i: (b, i, 0))],
        out_specs=pl.BlockSpec((1, C, C), lambda b, i: (b, 0, 0)),
        scratch_shapes=[pltpu.VMEM((C, C), jnp.float32)],
        compiler_params=_cparams("parallel", "arbitrary"),
    )(x_flat)

    return pl.pallas_call(
        _cam_apply_kernel,
        out_shape=jax.ShapeDtypeStruct((B, HW, C), out_dtype),
        grid=(B, HW // thw),
        in_specs=[
            pl.BlockSpec(memory_space=pltpu.MemorySpace.SMEM),
            pl.BlockSpec((1, C, C), lambda b, i: (b, 0, 0)),
            pl.BlockSpec((1, thw, C), lambda b, i: (b, i, 0)),
        ],
        out_specs=pl.BlockSpec((1, thw, C), lambda b, i: (b, i, 0)),
        compiler_params=_cparams("parallel", "parallel"),
    )(gamma, attn, x_flat)


# ----------------------------------------------------------------------------
# Bilinear upsample (align_corners=True) as two lane-dense slab matmuls
# ----------------------------------------------------------------------------

def _interp_matrix(n_in, n_out):
    # align_corners=True mapping: src = dst * (n_in - 1) / (n_out - 1)
    dst = jnp.arange(n_out, dtype=jnp.float32)
    src = dst * (n_in - 1) / max(n_out - 1, 1)
    i0 = jnp.clip(jnp.floor(src).astype(jnp.int32), 0, n_in - 1)
    i1 = jnp.clip(i0 + 1, 0, n_in - 1)
    frac = src - i0.astype(jnp.float32)
    W = jnp.zeros((n_out, n_in), jnp.float32)
    W = W.at[jnp.arange(n_out), i0].add(1.0 - frac)
    W = W.at[jnp.arange(n_out), i1].add(frac)
    return W


def bilinear_upsample_nhwc_to_nchw(y_nhwc, scale):
    # y_nhwc: (B, H, W, C) f32 -> (B, C, H*scale, W*scale) f32 (NCHW output,
    # matching F.interpolate(..., mode='bilinear', align_corners=True)).
    B, H, W, C = y_nhwc.shape
    Hout, Wout = int(H * scale), int(W * scale)
    Wr = _interp_matrix(H, Hout)                 # (Hout, H)
    Wc = _interp_matrix(W, Wout)                 # (Wout, W)

    # Row interpolation: (Hout, H) @ (H, B*W*C)
    t = jnp.transpose(y_nhwc, (1, 0, 2, 3)).reshape(H, B * W * C)
    t = matmul_tiled(Wr, t, out_dtype=jnp.float32)           # (Hout, B*W*C)
    t = t.reshape(Hout, B, W, C)

    # Column interpolation: (Wout, W) @ (W, Hout*B*C)
    u = jnp.transpose(t, (2, 0, 1, 3)).reshape(W, Hout * B * C)
    u = matmul_tiled(Wc, u, out_dtype=jnp.float32)            # (Wout, Hout*B*C)
    u = u.reshape(Wout, Hout, B, C)
    return jnp.transpose(u, (2, 3, 1, 0))                     # (B, C, Hout, Wout)


# ----------------------------------------------------------------------------
# Parameter folding / model glue
# ----------------------------------------------------------------------------

def _bn_fold(gamma, beta, mean, var, eps=1e-5):
    scale = gamma / jnp.sqrt(var + eps)
    bias = beta - mean * scale
    return scale, bias


def init_params(key, in_channels, num_classes):
    inter = in_channels // 4
    qk = inter // 8
    ks = iter(jax.random.split(key, 32))
    nrm = lambda shape, std=0.1: std * jax.random.normal(next(ks), shape, jnp.float32)

    def bn(c):
        # (gamma, beta, running_mean, running_var) -- deterministic, var > 0
        return (1.0 + nrm((c,), 0.05), nrm((c,), 0.05),
                nrm((c,), 0.05), 1.0 + jnp.abs(nrm((c,), 0.05)))

    return {
        "conv5a_w": nrm((inter, in_channels, 3, 3)), "conv5a_bn": bn(inter),
        "conv5c_w": nrm((inter, in_channels, 3, 3)), "conv5c_bn": bn(inter),
        "pam": {
            "q_w": nrm((qk, inter, 1, 1)), "q_b": nrm((qk,)),
            "k_w": nrm((qk, inter, 1, 1)), "k_b": nrm((qk,)),
            "v_w": nrm((inter, inter, 1, 1)), "v_b": nrm((inter,)),
            # PyTorch inits gamma to 0; nonzero so the attention path matters.
            "gamma": jnp.array([0.5], jnp.float32),
        },
        "cam_gamma": jnp.array([0.5], jnp.float32),
        "conv51_w": nrm((inter, inter, 3, 3)), "conv51_bn": bn(inter),
        "conv52_w": nrm((inter, inter, 3, 3)), "conv52_bn": bn(inter),
        "conv8_w": nrm((num_classes, inter, 1, 1)), "conv8_b": nrm((num_classes,)),
    }


def danet_head(x_nchw, p):
    B, Cin, H, W = x_nchw.shape
    HW = H * W
    inter = p["conv5a_w"].shape[0]
    num_classes = p["conv8_w"].shape[0]

    # single NCHW -> NHWC transpose; stay in NHWC slabs afterwards
    x = jnp.transpose(x_nchw, (0, 2, 3, 1)).astype(jnp.bfloat16)

    # -- Position-attention branch -------------------------------------------
    feat1 = conv3x3_bn_relu(x, p["conv5a_w"], p["conv5a_bn"])        # (B,H,W,inter)

    # fused q/k/v 1x1 convs (one matmul, concatenated weights)
    Cq = p["pam"]["q_w"].shape[0]
    w_qkv = jnp.concatenate([p["pam"]["q_w"].reshape(Cq, inter),
                             p["pam"]["k_w"].reshape(Cq, inter),
                             p["pam"]["v_w"].reshape(inter, inter)], axis=0).T
    b_qkv = jnp.concatenate([p["pam"]["q_b"], p["pam"]["k_b"], p["pam"]["v_b"]])
    qkv = matmul_tiled(feat1.reshape(B * HW, inter),
                       w_qkv.astype(jnp.bfloat16),
                       bias=b_qkv[None, :].astype(jnp.float32),
                       out_dtype=jnp.bfloat16, pad_lanes=True)
    q = qkv[:, :Cq].reshape(B, HW, Cq)
    k = qkv[:, Cq:2 * Cq].reshape(B, HW, Cq)
    v = qkv[:, 2 * Cq:2 * Cq + inter].reshape(B, HW, inter)

    sa_feat = pam_attention(q, k, v, feat1.reshape(B, HW, inter), p["pam"]["gamma"])
    sa_conv = conv3x3_bn_relu(sa_feat.reshape(B, H, W, inter),
                              p["conv51_w"], p["conv51_bn"])

    # -- Channel-attention branch --------------------------------------------
    feat2 = conv3x3_bn_relu(x, p["conv5c_w"], p["conv5c_bn"])
    sc_feat = cam_module(feat2.reshape(B, HW, inter), p["cam_gamma"])
    sc_conv = conv3x3_bn_relu(sc_feat.reshape(B, H, W, inter),
                              p["conv52_w"], p["conv52_bn"])

    # -- Fuse: conv8(sa_conv + sc_conv); the add is fused into the matmul.
    # Dropout2d(0.1) is identity in eval mode.
    w8 = p["conv8_w"].reshape(num_classes, inter).T
    sasc = matmul_tiled(sa_conv.reshape(B * HW, inter),
                        w8.astype(jnp.bfloat16),
                        bias=p["conv8_b"][None, :].astype(jnp.float32),
                        x2=sc_conv.reshape(B * HW, inter),
                        out_dtype=jnp.float32, pad_lanes=True)
    return sasc.reshape(B, H, W, num_classes)


def danet_forward(inputs, params, output_stride):
    y = danet_head(inputs[0], params)                       # (B, H, W, classes) NHWC
    return bilinear_upsample_nhwc_to_nchw(y, output_stride)  # (B, classes, Ho, Wo)


# ----------------------------------------------------------------------------
# Demo
# ----------------------------------------------------------------------------

if __name__ == "__main__":
    key = jax.random.PRNGKey(0)
    B, IN_CH, H, W = 2, 64, 8, 8          # small stand-in for (B, 2048, H, W)
    NUM_CLASSES = 5
    OUTPUT_STRIDE = 4

    params = init_params(key, IN_CH, NUM_CLASSES)
    x = jax.random.normal(jax.random.fold_in(key, 999), (B, IN_CH, H, W), jnp.float32)

    out = danet_forward([x], params, OUTPUT_STRIDE)
    out = jax.block_until_ready(out)

    assert out.shape == (B, NUM_CLASSES, H * OUTPUT_STRIDE, W * OUTPUT_STRIDE), out.shape
    assert bool(jnp.all(jnp.isfinite(out)))
    print("KERNEL_OK")
</pallas_src>

<mosaic_0001>
module attributes {stable_mosaic.version = 11 : i64} {
  func.func @_conv3x3_kernel(%arg0: i32, %arg1: i32, %arg2: i32, %arg3: memref<1x10x10x64xbf16, #tpu.memory_space<vmem>>, %arg4: memref<3x3x64x16xbf16, #tpu.memory_space<vmem>>, %arg5: memref<1x16xf32, #tpu.memory_space<vmem>>, %arg6: memref<1x16xf32, #tpu.memory_space<vmem>>, %arg7: memref<1x8x8x16xbf16, #tpu.memory_space<vmem>>, %arg8: memref<64x16xf32, #tpu.memory_space<vmem>>) attributes {dimension_semantics = [#tpu.dimension_semantics<parallel>, #tpu.dimension_semantics<parallel>, #tpu.dimension_semantics<arbitrary>], iteration_bounds = array<i64: 2, 1, 1>, scalar_prefetch = 0 : i64, scratch_operands = 1 : i64, tpu.core_type = #tpu.core_type<tc>, window_params = [{transform_indices = @transform_0, window_bounds = array<i64: 1, 10, 10, 64>}, {transform_indices = @transform_1, window_bounds = array<i64: 3, 3, 64, 16>}, {transform_indices = @transform_2, window_bounds = array<i64: 1, 16>}, {transform_indices = @transform_3, window_bounds = array<i64: 1, 16>}, {transform_indices = @transform_4, window_bounds = array<i64: 1, 8, 8, 16>}]} {
    %c0_i32 = arith.constant 0 : i32
    %0 = arith.cmpi eq, %arg2, %c0_i32 : i32
    %1 = arith.extui %0 : i1 to i32
    %c0_i32_0 = arith.constant 0 : i32
    %2 = arith.cmpi ne, %1, %c0_i32_0 : i32
    scf.if %2 {
      %cst_52 = arith.constant 0.000000e+00 : f32
      %64 = vector.broadcast %cst_52 : f32 to vector<64x16xf32>
      %c0_53 = arith.constant 0 : index
      %c0_54 = arith.constant 0 : index
      %65 = vector.load %arg8[%c0_53, %c0_54] : memref<64x16xf32, #tpu.memory_space<vmem>>, vector<64x16xf32>
      tpu.vector_store %arg8[%c0_53, %c0_54], %64 {strides = array<i32>} : memref<64x16xf32, #tpu.memory_space<vmem>>, vector<64x16xf32>,
    } else {
    }
    %c0 = arith.constant 0 : index
    %c0_1 = arith.constant 0 : index
    %c0_2 = arith.constant 0 : index
    %c0_3 = arith.constant 0 : index
    %3 = vector.load %arg3[%c0, %c0_1, %c0_2, %c0_3] : memref<1x10x10x64xbf16, #tpu.memory_space<vmem>>, vector<1x10x10x64xbf16>
    %4 = vector.shape_cast %3 : vector<1x10x10x64xbf16> to vector<10x10x64xbf16>
    %c0_4 = arith.constant 0 : index
    %c0_5 = arith.constant 0 : index
    %5 = vector.load %arg8[%c0_4, %c0_5] : memref<64x16xf32, #tpu.memory_space<vmem>>, vector<64x16xf32>
    %6 = vector.extract_strided_slice %4 {offsets = [0, 0, 0], sizes = [8, 8, 64], strides = [1, 1, 1]} : vector<10x10x64xbf16> to vector<8x8x64xbf16>
    %7 = vector.shape_cast %6 : vector<8x8x64xbf16> to vector<64x64xbf16>
    %c0_6 = arith.constant 0 : index
    %c0_7 = arith.constant 0 : index
    %c0_8 = arith.constant 0 : index
    %c0_9 = arith.constant 0 : index
    %8 = vector.load %arg4[%c0_6, %c0_7, %c0_8, %c0_9] : memref<3x3x64x16xbf16, #tpu.memory_space<vmem>>, vector<1x1x64x16xbf16>
    %9 = vector.shape_cast %8 : vector<1x1x64x16xbf16> to vector<64x16xbf16>
    %cst = arith.constant dense<0.000000e+00> : vector<64x16xf32>
    %10 = tpu.matmul %7, %9, %cst {dimension_numbers = #tpu.dot_dimension_numbers<[1], [0], [0], [1], [0, 0, 1, 1], [], []>} : vector<64x64xbf16>, vector<64x16xbf16>, vector<64x16xf32> -> vector<64x16xf32>
    %11 = arith.addf %5, %10 : vector<64x16xf32>
    %12 = vector.extract_strided_slice %4 {offsets = [0, 1, 0], sizes = [8, 8, 64], strides = [1, 1, 1]} : vector<10x10x64xbf16> to vector<8x8x64xbf16>
    %13 = vector.shape_cast %12 : vector<8x8x64xbf16> to vector<64x64xbf16>
    %c0_10 = arith.constant 0 : index
    %c1 = arith.constant 1 : index
    %c0_11 = arith.constant 0 : index
    %c0_12 = arith.constant 0 : index
    %14 = vector.load %arg4[%c0_10, %c1, %c0_11, %c0_12] : memref<3x3x64x16xbf16, #tpu.memory_space<vmem>>, vector<1x1x64x16xbf16>
    %15 = vector.shape_cast %14 : vector<1x1x64x16xbf16> to vector<64x16xbf16>
    %cst_13 = arith.constant dense<0.000000e+00> : vector<64x16xf32>
    %16 = tpu.matmul %13, %15, %cst_13 {dimension_numbers = #tpu.dot_dimension_numbers<[1], [0], [0], [1], [0, 0, 1, 1], [], []>} : vector<64x64xbf16>, vector<64x16xbf16>, vector<64x16xf32> -> vector<64x16xf32>
    %17 = arith.addf %11, %16 : vector<64x16xf32>
    %18 = vector.extract_strided_slice %4 {offsets = [0, 2, 0], sizes = [8, 8, 64], strides = [1, 1, 1]} : vector<10x10x64xbf16> to vector<8x8x64xbf16>
    %19 = vector.shape_cast %18 : vector<8x8x64xbf16> to vector<64x64xbf16>
    %c0_14 = arith.constant 0 : index
    %c2 = arith.constant 2 : index
    %c0_15 = arith.constant 0 : index
    %c0_16 = arith.constant 0 : index
    %20 = vector.load %arg4[%c0_14, %c2, %c0_15, %c0_16] : memref<3x3x64x16xbf16, #tpu.memory_space<vmem>>, vector<1x1x64x16xbf16>
    %21 = vector.shape_cast %20 : vector<1x1x64x16xbf16> to vector<64x16xbf16>
    %cst_17 = arith.constant dense<0.000000e+00> : vector<64x16xf32>
    %22 = tpu.matmul %19, %21, %cst_17 {dimension_numbers = #tpu.dot_dimension_numbers<[1], [0], [0], [1], [0, 0, 1, 1], [], []>} : vector<64x64xbf16>, vector<64x16xbf16>, vector<64x16xf32> -> vector<64x16xf32>
    %23 = arith.addf %17, %22 : vector<64x16xf32>
    %24 = vector.extract_strided_slice %4 {offsets = [1, 0, 0], sizes = [8, 8, 64], strides = [1, 1, 1]} : vector<10x10x64xbf16> to vector<8x8x64xbf16>
    %25 = vector.shape_cast %24 : vector<8x8x64xbf16> to vector<64x64xbf16>
    %c1_18 = arith.constant 1 : index
    %c0_19 = arith.constant 0 : index
    %c0_20 = arith.constant 0 : index
    %c0_21 = arith.constant 0 : index
    %26 = vector.load %arg4[%c1_18, %c0_19, %c0_20, %c0_21] : memref<3x3x64x16xbf16, #tpu.memory_space<vmem>>, vector<1x1x64x16xbf16>
    %27 = vector.shape_cast %26 : vector<1x1x64x16xbf16> to vector<64x16xbf16>
    %cst_22 = arith.constant dense<0.000000e+00> : vector<64x16xf32>
    %28 = tpu.matmul %25, %27, %cst_22 {dimension_numbers = #tpu.dot_dimension_numbers<[1], [0], [0], [1], [0, 0, 1, 1], [], []>} : vector<64x64xbf16>, vector<64x16xbf16>, vector<64x16xf32> -> vector<64x16xf32>
    %29 = arith.addf %23, %28 : vector<64x16xf32>
    %30 = vector.extract_strided_slice %4 {offsets = [1, 1, 0], sizes = [8, 8, 64], strides = [1, 1, 1]} : vector<10x10x64xbf16> to vector<8x8x64xbf16>
    %31 = vector.shape_cast %30 : vector<8x8x64xbf16> to vector<64x64xbf16>
    %c1_23 = arith.constant 1 : index
    %c1_24 = arith.constant 1 : index
    %c0_25 = arith.constant 0 : index
    %c0_26 = arith.constant 0 : index
    %32 = vector.load %arg4[%c1_23, %c1_24, %c0_25, %c0_26] : memref<3x3x64x16xbf16, #tpu.memory_space<vmem>>, vector<1x1x64x16xbf16>
    %33 = vector.shape_cast %32 : vector<1x1x64x16xbf16> to vector<64x16xbf16>
    %cst_27 = arith.constant dense<0.000000e+00> : vector<64x16xf32>
    %34 = tpu.matmul %31, %33, %cst_27 {dimension_numbers = #tpu.dot_dimension_numbers<[1], [0], [0], [1], [0, 0, 1, 1], [], []>} : vector<64x64xbf16>, vector<64x16xbf16>, vector<64x16xf32> -> vector<64x16xf32>
    %35 = arith.addf %29, %34 : vector<64x16xf32>
    %36 = vector.extract_strided_slice %4 {offsets = [1, 2, 0], sizes = [8, 8, 64], strides = [1, 1, 1]} : vector<10x10x64xbf16> to vector<8x8x64xbf16>
    %37 = vector.shape_cast %36 : vector<8x8x64xbf16> to vector<64x64xbf16>
    %c1_28 = arith.constant 1 : index
    %c2_29 = arith.constant 2 : index
    %c0_30 = arith.constant 0 : index
    %c0_31 = arith.constant 0 : index
    %38 = vector.load %arg4[%c1_28, %c2_29, %c0_30, %c0_31] : memref<3x3x64x16xbf16, #tpu.memory_space<vmem>>, vector<1x1x64x16xbf16>
    %39 = vector.shape_cast %38 : vector<1x1x64x16xbf16> to vector<64x16xbf16>
    %cst_32 = arith.constant dense<0.000000e+00> : vector<64x16xf32>
    %40 = tpu.matmul %37, %39, %cst_32 {dimension_numbers = #tpu.dot_dimension_numbers<[1], [0], [0], [1], [0, 0, 1, 1], [], []>} : vector<64x64xbf16>, vector<64x16xbf16>, vector<64x16xf32> -> vector<64x16xf32>
    %41 = arith.addf %35, %40 : vector<64x16xf32>
    %42 = vector.extract_strided_slice %4 {offsets = [2, 0, 0], sizes = [8, 8, 64], strides = [1, 1, 1]} : vector<10x10x64xbf16> to vector<8x8x64xbf16>
    %43 = vector.shape_cast %42 : vector<8x8x64xbf16> to vector<64x64xbf16>
    %c2_33 = arith.constant 2 : index
    %c0_34 = arith.constant 0 : index
    %c0_35 = arith.constant 0 : index
    %c0_36 = arith.constant 0 : index
    %44 = vector.load %arg4[%c2_33, %c0_34, %c0_35, %c0_36] : memref<3x3x64x16xbf16, #tpu.memory_space<vmem>>, vector<1x1x64x16xbf16>
    %45 = vector.shape_cast %44 : vector<1x1x64x16xbf16> to vector<64x16xbf16>
    %cst_37 = arith.constant dense<0.000000e+00> : vector<64x16xf32>
    %46 = tpu.matmul %43, %45, %cst_37 {dimension_numbers = #tpu.dot_dimension_numbers<[1], [0], [0], [1], [0, 0, 1, 1], [], []>} : vector<64x64xbf16>, vector<64x16xbf16>, vector<64x16xf32> -> vector<64x16xf32>
    %47 = arith.addf %41, %46 : vector<64x16xf32>
    %48 = vector.extract_strided_slice %4 {offsets = [2, 1, 0], sizes = [8, 8, 64], strides = [1, 1, 1]} : vector<10x10x64xbf16> to vector<8x8x64xbf16>
    %49 = vector.shape_cast %48 : vector<8x8x64xbf16> to vector<64x64xbf16>
    %c2_38 = arith.constant 2 : index
    %c1_39 = arith.constant 1 : index
    %c0_40 = arith.constant 0 : index
    %c0_41 = arith.constant 0 : index
    %50 = vector.load %arg4[%c2_38, %c1_39, %c0_40, %c0_41] : memref<3x3x64x16xbf16, #tpu.memory_space<vmem>>, vector<1x1x64x16xbf16>
    %51 = vector.shape_cast %50 : vector<1x1x64x16xbf16> to vector<64x16xbf16>
    %cst_42 = arith.constant dense<0.000000e+00> : vector<64x16xf32>
    %52 = tpu.matmul %49, %51, %cst_42 {dimension_numbers = #tpu.dot_dimension_numbers<[1], [0], [0], [1], [0, 0, 1, 1], [], []>} : vector<64x64xbf16>, vector<64x16xbf16>, vector<64x16xf32> -> vector<64x16xf32>
    %53 = arith.addf %47, %52 : vector<64x16xf32>
    %54 = vector.extract_strided_slice %4 {offsets = [2, 2, 0], sizes = [8, 8, 64], strides = [1, 1, 1]} : vector<10x10x64xbf16> to vector<8x8x64xbf16>
    %55 = vector.shape_cast %54 : vector<8x8x64xbf16> to vector<64x64xbf16>
    %c2_43 = arith.constant 2 : index
    %c2_44 = arith.constant 2 : index
    %c0_45 = arith.constant 0 : index
    %c0_46 = arith.constant 0 : index
    %56 = vector.load %arg4[%c2_43, %c2_44, %c0_45, %c0_46] : memref<3x3x64x16xbf16, #tpu.memory_space<vmem>>, vector<1x1x64x16xbf16>
    %57 = vector.shape_cast %56 : vector<1x1x64x16xbf16> to vector<64x16xbf16>
    %cst_47 = arith.constant dense<0.000000e+00> : vector<64x16xf32>
    %58 = tpu.matmul %55, %57, %cst_47 {dimension_numbers = #tpu.dot_dimension_numbers<[1], [0], [0], [1], [0, 0, 1, 1], [], []>} : vector<64x64xbf16>, vector<64x16xbf16>, vector<64x16xf32> -> vector<64x16xf32>
    %59 = arith.addf %53, %58 : vector<64x16xf32>
    %c0_48 = arith.constant 0 : index
    %c0_49 = arith.constant 0 : index
    %60 = vector.load %arg8[%c0_48, %c0_49] : memref<64x16xf32, #tpu.memory_space<vmem>>, vector<64x16xf32>
    tpu.vector_store %arg8[%c0_48, %c0_49], %59 {strides = array<i32>} : memref<64x16xf32, #tpu.memory_space<vmem>>, vector<64x16xf32>,
    %c0_i32_50 = arith.constant 0 : i32
    %61 = arith.cmpi eq, %arg2, %c0_i32_50 : i32
    %62 = arith.extui %61 : i1 to i32
    %c0_i32_51 = arith.constant 0 : i32
    %63 = arith.cmpi ne, %62, %c0_i32_51 : i32
    scf.if %63 {
      %c0_52 = arith.constant 0 : index
      %c0_53 = arith.constant 0 : index
      %64 = vector.load %arg8[%c0_52, %c0_53] : memref<64x16xf32, #tpu.memory_space<vmem>>, vector<64x16xf32>
      %c0_54 = arith.constant 0 : index
      %c0_55 = arith.constant 0 : index
      %65 = vector.load %arg5[%c0_54, %c0_55] : memref<1x16xf32, #tpu.memory_space<vmem>>, vector<1x16xf32>
      %66 = vector.broadcast %65 : vector<1x16xf32> to vector<64x16xf32>
      %67 = arith.mulf %64, %66 : vector<64x16xf32>
      %c0_56 = arith.constant 0 : index
      %c0_57 = arith.constant 0 : index
      %68 = vector.load %arg6[%c0_56, %c0_57] : memref<1x16xf32, #tpu.memory_space<vmem>>, vector<1x16xf32>
      %69 = vector.broadcast %68 : vector<1x16xf32> to vector<64x16xf32>
      %70 = arith.addf %67, %69 : vector<64x16xf32>
      %cst_58 = arith.constant 0.000000e+00 : f32
      %71 = vector.broadcast %cst_58 : f32 to vector<64x16xf32>
      %72 = arith.maximumf %70, %71 : vector<64x16xf32>
      %73 = vector.shape_cast %72 : vector<64x16xf32> to vector<8x8x16xf32>
      %74 = arith.truncf %73 : vector<8x8x16xf32> to vector<8x8x16xbf16>
      %c0_59 = arith.constant 0 : index
      %c0_60 = arith.constant 0 : index
      %c0_61 = arith.constant 0 : index
      %c0_62 = arith.constant 0 : index
      %75 = vector.load %arg7[%c0_59, %c0_60, %c0_61, %c0_62] : memref<1x8x8x16xbf16, #tpu.memory_space<vmem>>, vector<1x8x8x16xbf16>
      %76 = vector.shape_cast %75 : vector<1x8x8x16xbf16> to vector<8x8x16xbf16>
      %77 = vector.shape_cast %74 : vector<8x8x16xbf16> to vector<1x8x8x16xbf16>
      tpu.vector_store %arg7[%c0_59, %c0_60, %c0_61, %c0_62], %77 {strides = array<i32>} : memref<1x8x8x16xbf16, #tpu.memory_space<vmem>>, vector<1x8x8x16xbf16>,
    } else {
    }
    return
  }
  func.func @transform_0(%arg0: i32, %arg1: i32, %arg2: i32) -> (i32, i32, i32, i32) {
    %c0_i32 = arith.constant 0 : i32
    %c0_i32_0 = arith.constant 0 : i32
    %c0_i32_1 = arith.constant 0 : i32
    return %arg0, %c0_i32, %c0_i32_0, %arg2 : i32, i32, i32, i32
  }
  func.func @transform_1(%arg0: i32, %arg1: i32, %arg2: i32) -> (i32, i32, i32, i32) {
    %c0_i32 = arith.constant 0 : i32
    %c0_i32_0 = arith.constant 0 : i32
    %c0_i32_1 = arith.constant 0 : i32
    return %c0_i32, %c0_i32_0, %arg2, %arg1 : i32, i32, i32, i32
  }
  func.func @transform_2(%arg0: i32, %arg1: i32, %arg2: i32) -> (i32, i32) {
    %c0_i32 = arith.constant 0 : i32
    %c0_i32_0 = arith.constant 0 : i32
    return %c0_i32, %arg1 : i32, i32
  }
  func.func @transform_3(%arg0: i32, %arg1: i32, %arg2: i32) -> (i32, i32) {
    %c0_i32 = arith.constant 0 : i32
    %c0_i32_0 = arith.constant 0 : i32
    return %c0_i32, %arg1 : i32, i32
  }
  func.func @transform_4(%arg0: i32, %arg1: i32, %arg2: i32) -> (i32, i32, i32, i32) {
    %c0_i32 = arith.constant 0 : i32
    %c0_i32_0 = arith.constant 0 : i32
    %c0_i32_1 = arith.constant 0 : i32
    return %arg0, %c0_i32, %c0_i32_0, %arg1 : i32, i32, i32, i32
  }
}

</mosaic_0001>

<bundles_post_ra>
// kernel: tpu_custom_call.1
= control target key start
LH: loop header
LB: loop body
LE: loop exit
PB: predicated region body
PF: predicated region fallthrough
CT: control target
= control target key end

     0   :  { %9 = vsyncpa [#allocation4], 0  ;;  %s3114_s0 = inlined_call_operand.vmem [shape: bf16[2,10,10,64], index: 0, kind: input, shape index: {}]   ;;  %s3115_s1 = inlined_call_operand.vmem [shape: bf16[3,3,64,16], index: 1, kind: input, shape index: {}]   ;;  %s3116_s2 = inlined_call_operand.vmem [shape: f32[1,16], index: 2, kind: input, shape index: {}]   ;;  %s3117_s3 = inlined_call_operand.vmem [shape: f32[1,16], index: 3, kind: input, shape index: {}]   ;;  %s3118_s4 = inlined_call_operand.hbm [shape: bf16[2,8,8,16], index: 4, kind: output, shape index: {}]  }
   0x1   :  { %11 = vsyncpa [#allocation4 + $0x1], 0  ;;  %s2468_s15 = smov 0   ;;  %s2470_s16 = smov 0  }
   0x2   :  { %s2472_s17 = smov 0   ;;  %s2474_s18 = smov 0  }
   0x3   :  { %s2476_s19 = smov 0   ;;  %s2478_s20 = smov 0  }
   0x4 LB: > { %s1842_s21 = sadd.s32 4294967295, %s2437_s20   ;;  %s1843_s22 = sadd.s32 4294967294, %s2437_s20   ;;  %s2437_s20 = sphi %s2478_s20, %s17_s20   ;;  %s2433_s19 = sphi %s2476_s19, %s3129_s19   ;;  %s2429_s18 = sphi %s2474_s18, %s3128_s18   ;;  %s2425_s17 = sphi %s2472_s17, %s3127_s17   ;;  %s2421_s16 = sphi %s2470_s16, %s3126_s16   ;;  %s2417_s15 = sphi %s2468_s15, %s3125_s15  }
   0x5   : > { %s36_s23 = sadd.s32 1, %s2433_s19  ;;  %s153_s24 = sadd.s32 1, %s2425_s17 }
   0x6   : > { %p38_p0 = scmp.ge.s32.totalorder %s36_s23, 2  ;;  %p163_p1 = scmp.ne.s32.totalorder %s2425_s17, %s2421_s16 }
   0x7   : > { %p164_p2 = scmp.eq.s32.totalorder %s1842_s21, 1  ;;  %p169_p3 = scmp.ne.s32.totalorder %s2421_s16, %s2417_s15 }
   0x8   : > { %s3131_s23 = smov (%p38_p0, %s36_s23), 0  ;;  %p170_p5 = scmp.eq.s32.totalorder %s1843_s22, 1 }
   0x9   : > { %p2508_p4 = por %p164_p2, %p163_p1  ;;  %s148_s26 = ssub.s32 %s2433_s19, %s3131_s23 }
   0xa   : > { %p1849_p6 = scmp.ge.s32.totalorder %s2437_s20, 1  ;;  %p151_p7 = scmp.eq.s32.totalorder %s148_s26, 0 }
   0xb   : > { %p2515_p8 = por %p170_p5, %p169_p3  ;;  %p223_p9 = scmp.lt.s32.totalorder %s2437_s20, 3 }
   0xc   : > { %s2521_s28 = scalar_select %p151_p7, %s2425_s17, %s153_s24  }
   0xd   : > { %p224_p10 = pnand %p1849_p6, %p223_p9 }
   0xe   : > { %p266_p11 = scmp.lt.s32.totalorder (!%p224_p10), %s2429_s18, 1  ;;  %s263_s7 = sand.u32 (!%p224_p10), 1, %s2421_s16  }
   0xf   : > { %227 = sbr.rel (%p224_p10) target bundleno = 343 (0x157), region = 36  ;;  %s1850_s8 = sshll.u32 (!%p224_p10), %s263_s7, 5 }
  0x10   : > { %s2032_s10 = sshll.u32 (!%p224_p10), %s2429_s18, 9  ;;  %s2440_s22 = smov (!%p224_p10), [#allocation3]  }
  0x14   : > { %v2316_v0 = vld [vmem:[%s3115_s1 + $0x18] sm:$0xff]   ;;  %v2318_v2 = vld [vmem:[%s3115_s1 + $0x10] sm:$0xff]   ;;  %s267_s9 = scalar_select %p266_p11, %s2429_s18, 1  ;;  %v2320_v4 = vld [vmem:[%s3115_s1 + $0x8] sm:$0xff]   ;;  %vm294_vm0 = vcmask 130048   ;;  %vm383_vm1 = vcmask 523264  }
  0x15   : > { %v2317_v1 = vld [vmem:[%s3115_s1 + $0x38] sm:$0xff]   ;;  %2105 = vmatprep.subr.bf16.mxu0 %v2316_v0  ;;  %v2319_v3 = vld [vmem:[%s3115_s1 + $0x30] sm:$0xff]   ;;  %v2321_v5 = vld [vmem:[%s3115_s1 + $0x28] sm:$0xff]   ;;  %v2439_v9 = vmov 0.0   ;;  %vm469_vm2 = vsmask.f32 3328 }
  0x16   : > { %2121 = vmatprep.subr.bf16.mxu1 %v2317_v1  ;;  %2106 = vmatpush3.bf16.msra.mxu0 %v2316_v0  ;;  %s2257_s14 = smul.u32 80, %s267_s9  ;;  %v2322_v6 = vld [vmem:[%s3115_s1] sm:$0xff]   ;;  %297 = vst.msk [vmem:[#allocation2 + $0x10] sm:$0xff] %vm294_vm0, %v2439_v9  ;;  %295 = vst.msk [vmem:[#allocation2] sm:$0xff] %vm294_vm0, %v2439_v9  ;;  %v2326_v21 = vld [vmem:[%s3115_s1 + $0x58] sm:$0xff]   ;;  %vm722_vm4 = vcmask 1042432  }
  0x17   : > { %2122 = vmatpush3.bf16.msra.mxu1 %v2317_v1  ;;  %2107 = vmatprep.subr.bf16.mxu0 %v2318_v2  ;;  %296 = vst.msk [vmem:[#allocation2 + $0x8] sm:$0xff] %vm294_vm0, %v2439_v9  ;;  %298 = vst.msk [vmem:[#allocation2 + $0x18] sm:$0xff] %vm294_vm0, %v2439_v9  ;;  %v2323_v10 = vld [vmem:[%s3115_s1 + $0x20] sm:$0xff]   ;;  %vm470_vm3 = vsmask.f32 7440  ;;  %vm723_vm5 = vcmask 1046532  }
  0x18   : > { %2123 = vmatprep.subr.bf16.mxu1 %v2319_v3  ;;  %s2546_s29 = scalar_lea.vmem %s3114_s0, %s2257_s14  ;;  %299 = vst.msk [vmem:[#allocation2 + $0x20] sm:$0xff] %vm294_vm0, %v2439_v9  ;;  %300 = vst.msk [vmem:[#allocation2 + $0x28] sm:$0xff] %vm294_vm0, %v2439_v9  ;;  %v2614_v38 = vld [vmem:[%s3115_s1 + $0x78] sm:$0xff]   ;;  %v2328_v53 = vld [vmem:[%s3115_s1 + $0x50] sm:$0xff]   ;;  %vm1695_vm8 = vcmask 125952   ;;  %s3035_s9 = scalar_lea.vmem [#allocation3], %s1850_s8 }
  0x19   : > { %v2552_v7 = vld [vmem:[%s2546_s29] sm:$0xf]  ;;  %v2555_v8 = vld [vmem:[%s2546_s29 + $0x8] sm:$0xf]  ;;  %301 = vst.msk [vmem:[#allocation2 + $0x30] sm:$0xff] %vm294_vm0, %v2439_v9  ;;  %302 = vst.msk [vmem:[#allocation2 + $0x38] sm:$0xff] %vm294_vm0, %v2439_v9  ;;  %s3061_s14 = scalar_lea.hbm %s3118_s4, %s2032_s10 }
  0x1a   : > { %2108 = vmatpush3.bf16.msra.mxu0 %v2318_v2  ;;  %v1852_v11 = vcombine.low %v2552_v7, %v2555_v8  ;;  %v473_v12 = vshrl.u32 %v2552_v7, 16  ;;  %v476_v13 = vshll.u32 %v2552_v7, 16  ;;  %v2573_v14 = vld [vmem:[%s2546_s29 + $0x10] sm:$0xf]  ;;  %v2576_v15 = vld [vmem:[%s2546_s29 + $0x18] sm:$0xf]  ;;  %vm2621_vm6 = vmor %vm469_vm2, %vm470_vm3 }
  0x1b   : > { %2124 = vmatpush3.bf16.msra.mxu1 %v2319_v3  ;;  %2109 = vmatprep.subr.bf16.mxu0 %v2320_v4  ;;  %v2579_v16 = vld [vmem:[%s2546_s29 + $0x4] sm:$0x1]  ;;  %v1884_v17 = vrot.slane %v2552_v7, 9  ;;  %v1886_v18 = vrot.slane %v2573_v14, 9  ;;  %v1887_v19 = vrot.slane %v2576_v15, 9  ;;  %v2593_v22 = vcombine.low %v2573_v14, %v2576_v15  ;;  %v2332_v58 = vld [vmem:[%s3115_s1 + $0x48] sm:$0xff]   ;;  %vm2665_vm7 = vmor %vm722_vm4, %vm723_vm5 }
  0x1c   : > { %2125 = vmatprep.subr.bf16.mxu1 %v2321_v5  ;;  %2113 = vmatprep.mubr.msk.bf16.mxu0 %vm383_vm1, %v1852_v11  ;;  %v2586_v20 = vld [vmem:[%s2546_s29 + $0xc] sm:$0x1]  ;;  %v2596_v23 = vld [vmem:[%s2546_s29 + $0x14] sm:$0x1]  ;;  %v2599_v24 = vld [vmem:[%s2546_s29 + $0x1c] sm:$0x1] }
  0x1d   : > { %v2602_v25 = vld [vmem:[%s2546_s29 + $0x20] sm:$0xf]  ;;  %v475_v26 = vrot.slane %v473_v12, 4  ;;  %v478_v27 = vrot.slane %v476_v13, 5  ;;  %v482_v28 = vshll.u32 %v2579_v16, 16  ;;  %v487_v29 = vshrl.u32 %v2555_v8, 16 }
  0x1e   : > { %2110 = vmatpush3.bf16.msra.mxu0 %v2320_v4  ;;  %v490_v30 = vshll.u32 %v2555_v8, 16  ;;  %v496_v31 = vshll.u32 %v2586_v20, 16  ;;  %v501_v32 = vshrl.u32 %v2573_v14, 16  ;;  %v504_v33 = vshll.u32 %v2573_v14, 16  ;;  %v2617_v39 = vld [vmem:[%s2546_s29 + $0x24] sm:$0x1] }
  0x1f   : > { %2126 = vmatpush3.bf16.msra.mxu1 %v2321_v5  ;;  %2111 = vmatprep.subr.bf16.mxu0 %v2322_v6  ;;  %v479_v34 = vor.u32 %v478_v27, %v475_v26  ;;  %v484_v35 = vrot.slane %v482_v28, 5  ;;  %v489_v36 = vrot.slane %v487_v29, 4  ;;  %v510_v37 = vshll.u32 %v2596_v23, 16  ;;  %v2644_v3 = vld [vmem:[%s2546_s29 + $0x28] sm:$0xf]  ;;  %v2329_v28 = vld [vmem:[%s3115_s1 + $0x70] sm:$0xff]  }
  0x20   : > { %2127 = vmatprep.subr.bf16.mxu1 %v2323_v10  ;;  %v492_v41 = vrot.slane %v490_v30, 5  ;;  %v498_v42 = vrot.slane %v496_v31, 5  ;;  %v503_v43 = vrot.slane %v501_v32, 4  ;;  %v506_v44 = vrot.slane %v504_v33, 5  ;;  %v2660_v11 = vld [vmem:[%s2546_s29 + $0x38] sm:$0xf] }
  0x21   : > { %v480_v45 = vrot.slane %v479_v34, 4  ;;  %v512_v46 = vrot.slane %v510_v37, 5  ;;  %v515_v47 = vshrl.u32 %v2576_v15, 16  ;;  %v518_v48 = vshll.u32 %v2576_v15, 16  ;;  %v2670_v27 = vld [vmem:[%s2546_s29 + $0x2c] sm:$0x1] }
  0x22   : > { %2112 = vmatpush3.bf16.msra.mxu0 %v2322_v6  ;;  %v493_v49 = vor.u32 %v492_v41, %v489_v36  ;;  %v507_v50 = vor.u32 %v506_v44, %v503_v43  ;;  %v524_v51 = vshll.u32 %v2599_v24, 16  ;;  %v529_v52 = vshrl.u32 %v2602_v25, 16  ;;  %v2334_v30 = vld [vmem:[%s3115_s1 + $0x40] sm:$0xff]   ;;  %v2694_v34 = vld [vmem:[%s2546_s29 + $0x34] sm:$0x1]  ;;  %s1719_s11 = sshll.u32 %s3035_s9, 4  ;;  %s3063_s11 = int_to_ptr.vmem [resolvable:$true] %s1719_s11 }
  0x23   : > { %2128 = vmatpush3.bf16.msra.mxu1 %v2323_v10  ;;  %2137 = vmatprep.subr.bf16.mxu0 %v2326_v21  ;;  %v485_v54 = vsel %vm2621_vm6, %v480_v45, %v484_v35  ;;  %v517_v55 = vrot.slane %v515_v47, 4  ;;  %v520_v56 = vrot.slane %v518_v48, 5  ;;  %v532_v57 = vshll.u32 %v2602_v25, 16  ;;  %v2657_v10 = vld [vmem:[%s2546_s29 + $0x30] sm:$0xf]  ;;  %v2333_v47 = vld [vmem:[%s3115_s1 + $0x68] sm:$0xff]  }
  0x24   : > { %2153 = vmatprep.subr.bf16.mxu1 %v2614_v38  ;;  %v494_v59 = vrot.slane %v493_v49, 4  ;;  %v508_v60 = vrot.slane %v507_v50, 4  ;;  %v526_v61 = vrot.slane %v524_v51, 5  ;;  %v531_v62 = vrot.slane %v529_v52, 4  ;;  %v2705_v41 = vld [vmem:[%s2546_s29 + $0x3c] sm:$0x1] }
  0x25   : > { %2114 = vmatmul.mubr.msk.bf16.vlgmr.msra.gmra.mxu0 %vm383_vm1, %v2593_v22  ;;  %v521_v63 = vor.u32 %v520_v56, %v517_v55  ;;  %v534_v0 = vrot.slane %v532_v57, 5  ;;  %v538_v1 = vshll.u32 %v2617_v39, 16  ;;  %v727_v2 = vrot.slane %v2579_v16, 5  ;;  %v2337_v56 = vld [vmem:[%s3115_s1 + $0x98] sm:$0xff]   ;;  %s3069_s18 = scalar_lea.sflag [#allocation4], %s263_s7  ;;  %s2361_s21 = scalar_lea.vmem %s3063_s11, 512 }
  0x26   : > { %2138 = vmatpush3.bf16.msra.mxu0 %v2326_v21  ;;  %v2648_v4 = vsel %vm2621_vm6, %v494_v59, %v498_v42  ;;  %v2652_v5 = vsel %vm2621_vm6, %v508_v60, %v512_v46  ;;  %v731_v6 = vrot.slane %v2586_v20, 5  ;;  %v735_v9 = vrot.slane %v2596_v23, 5  ;;  %p2362_p12 = scmp.ne.s32.totalorder %s3063_s11, %s2361_s21 }
  0x27   : > { %2139 = vmatprep.subr.bf16.mxu0 %v2328_v53  ;;  %v522_v12 = vrot.slane %v521_v63, 4  ;;  %v535_v13 = vor.u32 %v534_v0, %v531_v62  ;;  %v540_v16 = vrot.slane %v538_v1, 5  ;;  %v1872_v21 = vcombine.low %v485_v54, %v2648_v4 }
  0x28   : > { %v739_v23 = vrot.slane %v2599_v24, 5  ;;  %v2678_v29 = vcombine.low %v2602_v25, %v2644_v3  ;;  %v2690_v24 = vcombine.low %v2657_v10, %v2660_v11  ;;  %v543_v33 = vshrl.u32 %v2644_v3, 16  ;;  %p2363_p13 = pnand %p2362_p12, %p2508_p4 }
  0x29   : > { %v2685_v31 = vsel %vm2621_vm6, %v522_v12, %v526_v61  ;;  %v536_v32 = vrot.slane %v535_v13, 4  ;;  %2129 = vmatprep.mubr.msk.bf16.mxu1 %vm383_vm1, %v1872_v21  ;;  %v546_v36 = vshll.u32 %v2644_v3, 16  ;;  %v552_v37 = vshll.u32 %v2670_v27, 16  ;;  %v2335_v12 = vld [vmem:[%s3115_s1 + $0x60] sm:$0xff]   ;;  %v2340_v21 = vld [vmem:[%s3115_s1 + $0x90] sm:$0xff]  }
  0x2a   : > { %2140 = vmatpush3.bf16.msra.mxu0 %v2328_v53  ;;  %v2698_v35 = vcombine.low %v2652_v5, %v2685_v31  ;;  %2117 = vmatprep.mubr.msk.bf16.mxu0 %vm383_vm1, %v2678_v29  ;;  %v2711_v42 = vsel %vm2665_vm7, %v1886_v18, %v735_v9  ;;  %v545_v43 = vrot.slane %v543_v33, 4  ;;  %v557_v44 = vshrl.u32 %v2657_v10, 16  ;;  %p2364_p0 = pneg %p2363_p13 }
  0x2b   : > { %2141 = vmatprep.subr.bf16.mxu0 %v2332_v58  ;;  %v2718_v45 = vsel %vm2621_vm6, %v536_v32, %v540_v16  ;;  %v2724_v46 = vsel %vm2665_vm7, %v1887_v19, %v739_v23  ;;  %v548_v18 = vrot.slane %v546_v36, 5  ;;  %v560_v48 = vshll.u32 %v2657_v10, 16 }
  0x2c   : > { %2130 = vmatmul.mubr.msk.bf16.vlgmr.msra.gmra.mxu1 %vm383_vm1, %v2698_v35  ;;  %v559_v49 = vrot.slane %v557_v44, 4  ;;  %v566_v50 = vshll.u32 %v2694_v34, 16  ;;  %v571_v51 = vshrl.u32 %v2660_v11, 16  ;;  %v574_v19 = vshll.u32 %v2660_v11, 16  ;;  %v2799_v44 = vld [vmem:[%s2546_s29 + $0x40] sm:$0xf] }
  0x2d   : > { %2118 = vmatmul.mubr.msk.bf16.gmra.mxu0 %vm383_vm1, %v2690_v24  ;;  %2154 = vmatpush3.bf16.msra.mxu1 %v2614_v38  ;;  %v549_v52 = vor.u32 %v548_v18, %v545_v43  ;;  %v554_v53 = vrot.slane %v552_v37, 5  ;;  %v562_v54 = vrot.slane %v560_v48, 5  ;;  %v580_v55 = vshll.u32 %v2705_v41, 16 }
  0x2e   : > { %2142 = vmatpush3.bf16.msra.mxu0 %v2332_v58  ;;  %2155 = vmatprep.subr.bf16.mxu1 %v2329_v28  ;;  %v573_v57 = vrot.slane %v571_v51, 4  ;;  %v576_v38 = vrot.slane %v574_v19, 5  ;;  %v728_v58 = vsel %vm2665_vm7, %v1884_v17, %v727_v2  ;;  %v1885_v59 = vrot.slane %v2555_v8, 9 }
  0x2f   : > { %2143 = vmatprep.subr.bf16.mxu0 %v2334_v30  ;;  %v2747_v60 = vcombine.low %v2711_v42, %v2724_v46  ;;  %v550_v61 = vrot.slane %v549_v52, 4  ;;  %v563_v62 = vor.u32 %v562_v54, %v559_v49  ;;  %v568_v63 = vrot.slane %v566_v50, 5  ;;  %v2343_v49 = vld [vmem:[%s3115_s1 + $0x88] sm:$0xff]   ;;  %v2346_v52 = vld [vmem:[%s3115_s1 + $0x80] sm:$0xff]  }
  0x30   : > { %v577_v0 = vor.u32 %v576_v38, %v573_v57  ;;  %v582_v1 = vrot.slane %v580_v55, 5  ;;  %v2753_v7 = vsel %vm2665_vm7, %v1885_v59, %v731_v6  ;;  %v1888_v17 = vrot.slane %v2602_v25, 9  ;;  %v2341_v38 = vld [vmem:[%s3115_s1 + $0xb0] sm:$0xff]  }
  0x31   : > { %2156 = vmatpush3.bf16.msra.mxu1 %v2329_v28  ;;  %v2758_v2 = vsel %vm2621_vm6, %v550_v61, %v554_v53  ;;  %v564_v9 = vrot.slane %v563_v62, 4  ;;  %v1900_v13 = vcombine.low %v728_v58, %v2753_v7  ;;  %v743_v20 = vrot.slane %v2617_v39, 5  ;;  %v2350_v62 = vld [vmem:[%s3115_s1 + $0xd0] sm:$0xff]  }
  0x32   : > { %2144 = vmatpush3.bf16.msra.mxu0 %v2334_v30  ;;  %2157 = vmatprep.subr.bf16.mxu1 %v2333_v47  ;;  %v2767_v6 = vcombine.low %v2718_v45, %v2758_v2  ;;  %v578_v16 = vrot.slane %v577_v0, 4  ;;  %v1889_v23 = vrot.slane %v2644_v3, 9  ;;  %v747_v28 = vrot.slane %v2670_v27, 5 }
  0x33   : > { %2169 = vmatprep.subr.bf16.mxu0 %v2337_v56  ;;  %v2776_v30 = vsel %vm2621_vm6, %v564_v9, %v568_v63  ;;  %2145 = vmatprep.mubr.msk.bf16.mxu0 %vm383_vm1, %v1900_v13  ;;  %v2781_v39 = vsel %vm2665_vm7, %v1888_v17, %v743_v20  ;;  %v1890_v32 = vrot.slane %v2657_v10, 9  ;;  %v751_v33 = vrot.slane %v2694_v34, 5  ;;  %v2349_v63 = vld [vmem:[%s3115_s1 + $0xf8] sm:$0xff]  }
  0x34   : > { %2133 = vmatprep.mubr.msk.bf16.mxu1 %vm383_vm1, %v2767_v6  ;;  %v2789_v27 = vsel %vm2621_vm6, %v578_v16, %v582_v1  ;;  %v1920_v36 = vcombine.low %v2555_v8, %v2573_v14  ;;  %v2795_v37 = vsel %vm2665_vm7, %v1889_v23, %v747_v28  ;;  %v1891_v43 = vrot.slane %v2660_v11, 9  ;;  %v2338_v8 = vld [vmem:[%s3115_s1 + $0xb8] sm:$0xff]   ;;  %v2357_v28 = vld [vmem:[%s3115_s1 + $0x110] sm:$0xff]  }
  0x35   : > { %2158 = vmatpush3.bf16.msra.mxu1 %v2333_v47  ;;  %v2803_v34 = vcombine.low %v2776_v30, %v2789_v27  ;;  %2146 = vmatmul.mubr.msk.bf16.vlgmr.msra.gmra.mxu0 %vm383_vm1, %v2747_v60  ;;  %v2812_v14 = vcombine.low %v2781_v39, %v2795_v37  ;;  %v755_v18 = vrot.slane %v2705_v41, 5  ;;  %v2817_v47 = vsel %vm2665_vm7, %v1890_v32, %v751_v33  ;;  %v2356_v13 = vld [vmem:[%s3115_s1 + $0x118] sm:$0xff]   ;;  %v322_v32 = vld [vmem:[%s2546_s29 + $0x4c] sm:$0x1]  ;;  %v2355_v33 = vld [vmem:[%s3115_s1 + $0xe0] sm:$0xff]  }
  0x36   : > { %2159 = vmatprep.subr.bf16.mxu1 %v2335_v12  ;;  %2170 = vmatpush3.bf16.msra.mxu0 %v2337_v56  ;;  %v1012_v41 = vshrl.u32 %v2799_v44, 16  ;;  %v1015_v50 = vshll.u32 %v2799_v44, 16  ;;  %v1940_v19 = vcombine.low %v2648_v4, %v2652_v5  ;;  %v1921_v55 = vcombine.low %v2576_v15, %v2602_v25  ;;  %v320_v56 = vld [vmem:[%s2546_s29 + $0x44] sm:$0x1]  ;;  %v2348_v4 = vld [vmem:[%s3115_s1 + $0xd8] sm:$0xff]   ;;  %v2344_v5 = vld [vmem:[%s3115_s1 + $0xa8] sm:$0xff]  }
  0x37   : > { %2134 = vmatmul.mubr.msk.bf16.gmra.mxu1 %vm383_vm1, %v2803_v34  ;;  %2171 = vmatprep.subr.bf16.mxu0 %v2340_v21  ;;  %v2823_v48 = vsel %vm2665_vm7, %v1891_v43, %v755_v18  ;;  %v1922_v57 = vcombine.low %v2644_v3, %v2657_v10  ;;  %v1021_v25 = vshll.u32 %v320_v56, 16  ;;  %v1941_v3 = vcombine.low %v2685_v31, %v2718_v45  ;;  %v2347_v45 = vld [vmem:[%s3115_s1 + $0xa0] sm:$0xff]  }
  0x38   : > { %2161 = vmatprep.mubr.msk.bf16.mxu1 %vm383_vm1, %v1920_v36  ;;  %2149 = vmatprep.mubr.msk.bf16.mxu0 %vm383_vm1, %v2812_v14  ;;  %v2835_v51 = vcombine.low %v2817_v47, %v2823_v48  ;;  %v1014_v53 = vrot.slane %v1012_v41, 4  ;;  %v1017_v54 = vrot.slane %v1015_v50, 5  ;;  %v1942_v10 = vcombine.low %v2758_v2, %v2776_v30 }
  0x39   : > { %2160 = vmatpush3.bf16.msra.mxu1 %v2335_v12  ;;  %v1023_v59 = vrot.slane %v1021_v25, 5  ;;  %v1923_v61 = vcombine.low %v2660_v11, %v2799_v44  ;;  %v1961_v31 = vcombine.low %v2753_v7, %v2711_v42  ;;  %v2352_v42 = vld [vmem:[%s3115_s1 + $0xc8] sm:$0xff]   ;;  %v1962_v1 = vcombine.low %v2724_v46, %v2781_v39  ;;  %v2354_v7 = vld [vmem:[%s3115_s1 + $0xc0] sm:$0xff]   ;;  %v2351_v12 = vld [vmem:[%s3115_s1 + $0xf0] sm:$0xff]  }
  0x3a   : > { %2185 = vmatprep.subr.bf16.mxu1 %v2338_v8  ;;  %2172 = vmatpush3.bf16.msra.mxu0 %v2340_v21  ;;  %v1018_v15 = vor.u32 %v1017_v54, %v1014_v53  ;;  %v1963_v17 = vcombine.low %v2795_v37, %v2817_v47  ;;  %v1952_v2 = vrot.slane %v2799_v44, 9  ;;  %v1151_v9 = vrot.slane %v320_v56, 5  ;;  %v321_v46 = vld [vmem:[%s2546_s29 + $0x48] sm:$0xf]  ;;  %s2365_s29 = sshll.u32 %s2440_s22, 4  ;;  %s2366_s29 = int_to_ptr.vmem [resolvable:$false] %s2365_s29 }
  0x3b   : > { %2173 = vmatprep.subr.bf16.mxu0 %v2343_v49  ;;  %v1389_v16 = vshrl.u32 %v321_v46, 16  ;;  %v1392_v21 = vshll.u32 %v321_v46, 16  ;;  %v1398_v37 = vshll.u32 %v322_v32, 16  ;;  %v2007_v18 = vrot.slane %v321_v46, 9  ;;  %s2367_s24 = scalar_lea.vmem %s2366_s29, 1024  ;;  %p2368_p1 = scmp.lt.s32.totalorder %s3063_s11, %s2366_s29 }
  0x3c   : > { %v1019_v58 = vrot.slane %v1018_v15, 4  ;;  %v1152_v20 = vsel %vm2665_vm7, %v1952_v2, %v1151_v9  ;;  %v1516_v47 = vrot.slane %v322_v32, 5  ;;  %v323_v2 = vld [vmem:[#allocation2] sm:$0xff]  ;;  %p2369_p2 = scmp.lt.s32.totalorder %s2367_s24, %s2361_s21 }
  0x3d   : > { %2150 = vmatmul.mubr.msk.bf16.gmra.mxu0 %vm383_vm1, %v2835_v51  ;;  %v1964_v23 = vcombine.low %v2823_v48, %v1152_v20  ;;  %v1391_v30 = vrot.slane %v1389_v16, 4  ;;  %v1394_v39 = vrot.slane %v1392_v21, 5 }
  0x3e   : > { %2174 = vmatpush3.bf16.msra.mxu0 %v2343_v49  ;;  %2177 = vmatprep.mubr.msk.bf16.mxu0 %vm383_vm1, %v1940_v19  ;;  %v2879_v11 = vsel %vm2621_vm6, %v1019_v58, %v1023_v59  ;;  %p2370_p3 = por %p2369_p2, %p2368_p1 }
  0x3f   : > { %2162 = vmatmul.mubr.msk.bf16.vlgmr.msra.gmra.mxu1 %vm383_vm1, %v1921_v55  ;;  %2175 = vmatprep.subr.bf16.mxu0 %v2346_v52  ;;  %v1943_v0 = vcombine.low %v2789_v27, %v2879_v11  ;;  %v2359_v27 = vld [vmem:[%s3115_s1 + $0x108] sm:$0xff]   ;;  %v1395_v36 = vor.u32 %v1394_v39, %v1391_v30 }
  0x40   : > { %2186 = vmatpush3.bf16.msra.mxu1 %v2338_v8  ;;  %2165 = vmatprep.mubr.msk.bf16.mxu1 %vm383_vm1, %v1922_v57  ;;  %v1400_v8 = vrot.slane %v1398_v37, 5  ;;  %p2371_p5 = pnand %p2370_p3, %p2364_p0 }
  0x41   : > { %2187 = vmatprep.subr.bf16.mxu1 %v2341_v38  ;;  %v1396_v43 = vrot.slane %v1395_v36, 4 }
  0x42   : > { %2176 = vmatpush3.bf16.msra.mxu0 %v2346_v52 }
  0x43   : > { %2201 = vmatprep.subr.bf16.mxu0 %v2348_v4 }
  0x44   : > { %2188 = vmatpush3.bf16.msra.mxu1 %v2341_v38 }
  0x45   : > { %2189 = vmatprep.subr.bf16.mxu1 %v2344_v5  ;;  %2178 = vmatmul.mubr.msk.bf16.vlgmr.msra.gmra.mxu0 %vm383_vm1, %v1941_v3 }
  0x46   : > { %2202 = vmatpush3.bf16.msra.mxu0 %v2348_v4  ;;  %2181 = vmatprep.mubr.msk.bf16.mxu0 %vm383_vm1, %v1942_v10 }
  0x47   : > { %2166 = vmatmul.mubr.msk.bf16.gmra.mxu1 %vm383_vm1, %v1923_v61  ;;  %2203 = vmatprep.subr.bf16.mxu0 %v2350_v62 }
  0x48   : > { %2190 = vmatpush3.bf16.msra.mxu1 %v2344_v5  ;;  %2193 = vmatprep.mubr.msk.bf16.mxu1 %vm383_vm1, %v1961_v31 }
  0x49   : > { %2191 = vmatprep.subr.bf16.mxu1 %v2347_v45 }
  0x4a   : > { %2204 = vmatpush3.bf16.msra.mxu0 %v2350_v62 }
  0x4b   : > { %2205 = vmatprep.subr.bf16.mxu0 %v2352_v42 }
  0x4c   : > { %2192 = vmatpush3.bf16.msra.mxu1 %v2347_v45 }
  0x4d   : > { %2217 = vmatprep.subr.bf16.mxu1 %v2349_v63  ;;  %2182 = vmatmul.mubr.msk.bf16.gmra.mxu0 %vm383_vm1, %v1943_v0 }
  0x4e   : > { %2206 = vmatpush3.bf16.msra.mxu0 %v2352_v42  ;;  %2209 = vmatprep.mubr.msk.bf16.mxu0 %vm383_vm1, %v2593_v22  ;;  %v2353_v22 = vld [vmem:[%s3115_s1 + $0xe8] sm:$0xff]  }
  0x4f   : > { %2194 = vmatmul.mubr.msk.bf16.vlgmr.msra.gmra.mxu1 %vm383_vm1, %v1962_v1  ;;  %2207 = vmatprep.subr.bf16.mxu0 %v2354_v7  ;;  %v325_v1 = vld [vmem:[#allocation2 + $0x10] sm:$0xff] }
  0x50   : > { %2218 = vmatpush3.bf16.msra.mxu1 %v2349_v63  ;;  %2197 = vmatprep.mubr.msk.bf16.mxu1 %vm383_vm1, %v1963_v17 }
  0x51   : > { %2219 = vmatprep.subr.bf16.mxu1 %v2351_v12 }
  0x52   : > { %2208 = vmatpush3.bf16.msra.mxu0 %v2354_v7 }
  0x53   : > { %2233 = vmatprep.subr.bf16.mxu0 %v2356_v13 }
  0x54   : > { %2220 = vmatpush3.bf16.msra.mxu1 %v2351_v12 }
  0x55   : > { %2221 = vmatprep.subr.bf16.mxu1 %v2353_v22  ;;  %2210 = vmatmul.mubr.msk.bf16.vlgmr.msra.gmra.mxu0 %vm383_vm1, %v2678_v29  ;;  %v1981_v29 = vcombine.low %v2799_v44, %v321_v46 }
  0x56   : > { %2234 = vmatpush3.bf16.msra.mxu0 %v2356_v13  ;;  %2213 = vmatprep.mubr.msk.bf16.mxu0 %vm383_vm1, %v2690_v24  ;;  %v2360_v24 = vld [vmem:[%s3115_s1 + $0x100] sm:$0xff]  }
  0x57   : > { %2198 = vmatmul.mubr.msk.bf16.gmra.mxu1 %vm383_vm1, %v1964_v23  ;;  %2235 = vmatprep.subr.bf16.mxu0 %v2357_v28 }
  0x58   : > { %2222 = vmatpush3.bf16.msra.mxu1 %v2353_v22  ;;  %2225 = vmatprep.mubr.msk.bf16.mxu1 %vm383_vm1, %v2698_v35  ;;  %v1401_v35 = vsel %vm2621_vm6, %v1396_v43, %v1400_v8  ;;  %v324_v22 = vld [vmem:[#allocation2 + $0x8] sm:$0xff] }
  0x59   : > { %2223 = vmatprep.subr.bf16.mxu1 %v2355_v33  ;;  %v1998_v44 = vcombine.low %v2879_v11, %v1401_v35  ;;  %v327_v35 = vld [vmem:[#allocation2 + $0x20] sm:$0xff] }
  0x5a   : > { %2236 = vmatpush3.bf16.msra.mxu0 %v2357_v28 }
  0x5b   : > { %2237 = vmatprep.subr.bf16.mxu0 %v2359_v27 }
  0x5c   : > { %2224 = vmatpush3.bf16.msra.mxu1 %v2355_v33 }
  0x5d   : > { %2249 = vmatprep.subr.bf16.mxu1 %v2356_v13  ;;  %2214 = vmatmul.mubr.msk.bf16.gmra.mxu0 %vm383_vm1, %v1981_v29  ;;  %v329_v29 = vld [vmem:[#allocation2 + $0x30] sm:$0xff] }
  0x5e   : > { %2238 = vmatpush3.bf16.msra.mxu0 %v2359_v27  ;;  %2241 = vmatprep.mubr.msk.bf16.mxu0 %vm383_vm1, %v2747_v60  ;;  %v1517_v60 = vsel %vm2665_vm7, %v2007_v18, %v1516_v47 }
  0x5f   : > { %2226 = vmatmul.mubr.msk.bf16.vlgmr.msra.gmra.mxu1 %vm383_vm1, %v2767_v6  ;;  %2239 = vmatprep.subr.bf16.mxu0 %v2360_v24  ;;  %v2016_v40 = vcombine.low %v1152_v20, %v1517_v60 }
  0x60   : > { %2253 = vmatpush3.bf16.msra.mxu1 %v2356_v13  ;;  %2229 = vmatprep.mubr.msk.bf16.mxu1 %vm383_vm1, %v2803_v34  ;;  %v326_v13 = vld [vmem:[#allocation2 + $0x18] sm:$0xff] }
  0x61   : > { %2250 = vmatprep.subr.bf16.mxu1 %v2357_v28 }
  0x62   : > { %2240 = vmatpush3.bf16.msra.mxu0 %v2360_v24 }
  0x64   : > { %2254 = vmatpush3.bf16.msra.mxu1 %v2357_v28 }
  0x65   : > { %2251 = vmatprep.subr.bf16.mxu1 %v2359_v27  ;;  %2242 = vmatmul.mubr.msk.bf16.vlgmr.msra.gmra.mxu0 %vm383_vm1, %v2812_v14 }
  0x67   : > { %2230 = vmatmul.mubr.msk.bf16.gmra.mxu1 %vm383_vm1, %v1998_v44 }
  0x68   : > { %2255 = vmatpush3.bf16.msra.mxu1 %v2359_v27  ;;  %2245 = vmatprep.mubr.msk.bf16.mxu1 %vm383_vm1, %v2835_v51 }
  0x69   : > { %2252 = vmatprep.subr.bf16.mxu1 %v2360_v24 }
  0x6c   : > { %2256 = vmatpush3.bf16.msra.mxu1 %v2360_v24 }
  0x6f   : > { %2246 = vmatmul.mubr.msk.bf16.vlgmr.msra.gmra.mxu1 %vm383_vm1, %v2016_v40 }
  0xe5   : > { %v2115_v6 = vpop.f32.mrf.mxu0 }
  0xe6   : > { %v463_v46 = vadd.f32 %v2115_v6, %v325_v1  ;;  %v330_v6 = vld [vmem:[#allocation2 + $0x38] sm:$0xff] }
  0xe7   : > { %v430_v34 = vpop.f32.mrf.mxu0 }
  0xe8   : > { %v461_v21 = vadd.f32 %v430_v34, %v323_v2 }
  0xe9   : > { %v2116_v48 = vpop.f32.mrf.mxu0 }
  0xea   : > { %v464_v39 = vadd.f32 %v2116_v48, %v326_v13 }
  0xeb   : > { %v433_v49 = vpop.f32.mrf.mxu0 }
  0xec   : > { %v2131_v14 = vpop.f32.mrf.mxu1  ;;  %v462_v36 = vadd.f32 %v433_v49, %v324_v22 }
  0xed   : > { %v2119_v41 = vpop.f32.mrf.mxu0  ;;  %v708_v30 = vadd.f32 %v2131_v14, %v463_v46 }
  0xee   : > { %v675_v19 = vpop.f32.mrf.mxu1  ;;  %v467_v40 = vadd.f32 %v2119_v41, %v329_v29 }
  0xef   : > { %v446_v50 = vpop.f32.mrf.mxu0  ;;  %v706_v27 = vadd.f32 %v675_v19, %v461_v21 }
  0xf0   : > { %v2132_v26 = vpop.f32.mrf.mxu1  ;;  %v465_v48 = vadd.f32 %v446_v50, %v327_v35 }
  0xf1   : > { %v2956_v52 = vpop.f32.mrf.mxu0  ;;  %v709_v8 = vadd.f32 %v2132_v26, %v464_v39 }
  0xf2   : > { %v678_v54 = vpop.f32.mrf.mxu1 }
  0xf3   : > { %v2958_v53 = vpop.f32.mrf.mxu0  ;;  %v707_v60 = vadd.f32 %v678_v54, %v462_v36 }
  0xf5   : > { %v2147_v51 = vpop.f32.mrf.mxu0 }
  0xf6   : > { %v881_v37 = vadd.f32 %v2147_v51, %v708_v30  ;;  %v468_v51 = vadd.f32 %v2956_v52, %v330_v6 }
  0xf7   : > { %v2960_v55 = vpop.f32.mrf.mxu1  ;;  %v848_v56 = vpop.f32.mrf.mxu0 }
  0xf8   : > { %v879_v44 = vadd.f32 %v848_v56, %v706_v27  ;;  %v712_v26 = vadd.f32 %v2960_v55, %v467_v40  ;;  %v328_v56 = vld [vmem:[#allocation2 + $0x28] sm:$0xff] }
  0xf9   : > { %v2962_v57 = vpop.f32.mrf.mxu1  ;;  %v2148_v38 = vpop.f32.mrf.mxu0  ;;  %v466_v52 = vadd.f32 %v2958_v53, %v328_v56 }
  0xfa   : > { %v882_v14 = vadd.f32 %v2148_v38, %v709_v8  ;;  %v710_v41 = vadd.f32 %v2962_v57, %v465_v48 }
  0xfb   : > { %v2964_v4 = vpop.f32.mrf.mxu1  ;;  %v851_v15 = vpop.f32.mrf.mxu0 }
  0xfc   : > { %v880_v19 = vadd.f32 %v851_v15, %v707_v60 }
  0xfd   : > { %v2966_v25 = vpop.f32.mrf.mxu1  ;;  %v2968_v3 = vpop.f32.mrf.mxu0 }
  0xff   : > { %v2163_v5 = vpop.f32.mrf.mxu1  ;;  %v2970_v10 = vpop.f32.mrf.mxu0 }
 0x100   : > { %v1005_v34 = vadd.f32 %v2163_v5, %v881_v37  ;;  %v885_v5 = vadd.f32 %v2968_v3, %v712_v26  ;;  %v883_v39 = vadd.f32 %v2970_v10, %v710_v41 }
 0x101   : > { %v972_v58 = vpop.f32.mrf.mxu1  ;;  %v2972_v59 = vpop.f32.mrf.mxu0 }
 0x102   : > { %v1003_v46 = vadd.f32 %v972_v58, %v879_v44 }
 0x103   : > { %v2164_v61 = vpop.f32.mrf.mxu1  ;;  %v2974_v62 = vpop.f32.mrf.mxu0 }
 0x104   : > { %v1006_v22 = vadd.f32 %v2164_v61, %v882_v14 }
 0x105   : > { %v975_v31 = vpop.f32.mrf.mxu1  ;;  %v2179_v45 = vpop.f32.mrf.mxu0 }
 0x106   : > { %v1142_v49 = vadd.f32 %v2179_v45, %v1005_v34  ;;  %v1004_v50 = vadd.f32 %v975_v31, %v880_v19  ;;  %v713_v45 = vadd.f32 %v2964_v4, %v468_v51 }
 0x107   : > { %v2976_v11 = vpop.f32.mrf.mxu1  ;;  %v1109_v42 = vpop.f32.mrf.mxu0 }
 0x108   : > { %v1140_v30 = vadd.f32 %v1109_v42, %v1003_v46  ;;  %v886_v57 = vadd.f32 %v2972_v59, %v713_v45  ;;  %v1009_v31 = vadd.f32 %v2976_v11, %v885_v5 }
 0x109   : > { %v2978_v63 = vpop.f32.mrf.mxu1  ;;  %v2180_v0 = vpop.f32.mrf.mxu0 }
 0x10a   : > { %v1143_v15 = vadd.f32 %v2180_v0, %v1006_v22  ;;  %v711_v0 = vadd.f32 %v2966_v25, %v466_v52  ;;  %v1007_v4 = vadd.f32 %v2978_v63, %v883_v39 }
 0x10b   : > { %v2980_v7 = vpop.f32.mrf.mxu1  ;;  %v1112_v17 = vpop.f32.mrf.mxu0 }
 0x10c   : > { %v1141_v42 = vadd.f32 %v1112_v17, %v1004_v50  ;;  %v884_v59 = vadd.f32 %v2974_v62, %v711_v0 }
 0x10d   : > { %v2982_v9 = vpop.f32.mrf.mxu1  ;;  %v2984_v12 = vpop.f32.mrf.mxu0 }
 0x10e   : > { %v1146_v35 = vadd.f32 %v2984_v12, %v1009_v31 }
 0x10f   : > { %v2195_v20 = vpop.f32.mrf.mxu1  ;;  %v2986_v16 = vpop.f32.mrf.mxu0 }
 0x110   : > { %v1270_v58 = vadd.f32 %v2195_v20, %v1142_v49  ;;  %v1144_v11 = vadd.f32 %v2986_v16, %v1007_v4 }
 0x111   : > { %v1237_v23 = vpop.f32.mrf.mxu1  ;;  %v2988_v28 = vpop.f32.mrf.mxu0 }
 0x112   : > { %v1268_v61 = vadd.f32 %v1237_v23, %v1140_v30 }
 0x113   : > { %v2196_v32 = vpop.f32.mrf.mxu1  ;;  %v2990_v33 = vpop.f32.mrf.mxu0 }
 0x114   : > { %v1271_v3 = vadd.f32 %v2196_v32, %v1143_v15 }
 0x115   : > { %v1240_v24 = vpop.f32.mrf.mxu1  ;;  %v2211_v43 = vpop.f32.mrf.mxu0 }
 0x116   : > { %v1382_v36 = vadd.f32 %v2211_v43, %v1270_v58  ;;  %v1269_v10 = vadd.f32 %v1240_v24, %v1141_v42  ;;  %v1010_v43 = vadd.f32 %v2980_v7, %v886_v57  ;;  %v1008_v7 = vadd.f32 %v2982_v9, %v884_v59  ;;  %v3018_v9 = vld [vmem:[%s3116_s2] ss:$0 sm:$0xff] }
 0x117   : > { %v2199_v18 = vpop.f32.mrf.mxu1  ;;  %v1349_v47 = vpop.f32.mrf.mxu0 }
 0x118   : > { %v1380_v20 = vadd.f32 %v1349_v47, %v1268_v61  ;;  %v1274_v6 = vadd.f32 %v2199_v18, %v1146_v35  ;;  %v1147_v24 = vadd.f32 %v2988_v28, %v1010_v43  ;;  %v1145_v19 = vadd.f32 %v2990_v33, %v1008_v7 }
 0x119   : > { %v1253_v1 = vpop.f32.mrf.mxu1  ;;  %v2212_v2 = vpop.f32.mrf.mxu0 }
 0x11a   : > { %v1383_v17 = vadd.f32 %v2212_v2, %v1271_v3  ;;  %v1272_v48 = vadd.f32 %v1253_v1, %v1144_v11 }
 0x11b   : > { %v2200_v13 = vpop.f32.mrf.mxu1  ;;  %v1352_v21 = vpop.f32.mrf.mxu0 }
 0x11c   : > { %v1381_v47 = vadd.f32 %v1352_v21, %v1269_v10  ;;  %v1275_v28 = vadd.f32 %v2200_v13, %v1147_v24  ;;  %v2026_v13 = vld [vmem:[%s3117_s3] ss:$0 sm:$0xff] }
 0x11d   : > { %v2995_v54 = vpop.f32.mrf.mxu1  ;;  %v2215_v38 = vpop.f32.mrf.mxu0 }
 0x11e   : > { %v1386_v46 = vadd.f32 %v2215_v38, %v1274_v6  ;;  %v1273_v33 = vadd.f32 %v2995_v54, %v1145_v19 }
 0x11f   : > { %v2227_v55 = vpop.f32.mrf.mxu1  ;;  %v1365_v27 = vpop.f32.mrf.mxu0 }
 0x120   : > { %v1507_v23 = vadd.f32 %v2227_v55, %v1382_v36  ;;  %v1384_v51 = vadd.f32 %v1365_v27, %v1272_v48 }
 0x121   : > { %v1474_v37 = vpop.f32.mrf.mxu1  ;;  %v2216_v29 = vpop.f32.mrf.mxu0 }
 0x122   : > { %v1505_v32 = vadd.f32 %v1474_v37, %v1380_v20  ;;  %v1387_v56 = vadd.f32 %v2216_v29, %v1275_v28 }
 0x123   : > { %v2228_v53 = vpop.f32.mrf.mxu1  ;;  %v1368_v8 = vpop.f32.mrf.mxu0 }
 0x124   : > { %v1508_v34 = vadd.f32 %v2228_v53, %v1383_v17  ;;  %v1385_v5 = vadd.f32 %v1368_v8, %v1273_v33 }
 0x125   : > { %v1477_v44 = vpop.f32.mrf.mxu1  ;;  %v2243_v60 = vpop.f32.mrf.mxu0 }
 0x126   : > { %v1623_v25 = vadd.f32 %v2243_v60, %v1507_v23  ;;  %v1506_v2 = vadd.f32 %v1477_v44, %v1381_v47 }
 0x127   : > { %v2231_v40 = vpop.f32.mrf.mxu1  ;;  %v1590_v63 = vpop.f32.mrf.mxu0 }
 0x128   : > { %1632 = vst.msk [vmem:[#allocation2 + $0x10] sm:$0xff] %vm294_vm0, %v1623_v25  ;;  %v1621_v12 = vadd.f32 %v1590_v63, %v1505_v32  ;;  %v1511_v1 = vadd.f32 %v2231_v40, %v1386_v46 }
 0x129   : > { %v1490_v14 = vpop.f32.mrf.mxu1  ;;  %v2244_v62 = vpop.f32.mrf.mxu0 }
 0x12a   : > { %1630 = vst.msk [vmem:[#allocation2] sm:$0xff] %vm294_vm0, %v1621_v12  ;;  %v1624_v16 = vadd.f32 %v2244_v62, %v1508_v34  ;;  %v1509_v41 = vadd.f32 %v1490_v14, %v1384_v51 }
 0x12b   : > { %v2232_v18 = vpop.f32.mrf.mxu1  ;;  %v1593_v49 = vpop.f32.mrf.mxu0 }
 0x12c   : > { %1633 = vst.msk [vmem:[#allocation2 + $0x18] sm:$0xff] %vm294_vm0, %v1624_v16  ;;  %v1622_v21 = vadd.f32 %v1593_v49, %v1506_v2  ;;  %v1512_v45 = vadd.f32 %v2232_v18, %v1387_v56 }
 0x12d   : > { %v1493_v26 = vpop.f32.mrf.mxu1 }
 0x12e   : > { %1631 = vst.msk [vmem:[#allocation2 + $0x8] sm:$0xff] %vm294_vm0, %v1622_v21  ;;  %v1510_v37 = vadd.f32 %v1493_v26, %v1385_v5 }
 0x12f   : > { %v1643_v22 = vld [vmem:[#allocation2 + $0x10] sm:$0xff]  ;;  %v2247_v30 = vpop.f32.mrf.mxu1 }
 0x130   : > { %v1658_v38 = vmul.f32 %v3018_v9, %v1643_v22  ;;  %v1627_v50 = vadd.f32 %v2247_v30, %v1511_v1 }
 0x131   : > { %v1641_v58 = vld [vmem:[#allocation2] sm:$0xff]  ;;  %v1606_v15 = vpop.f32.mrf.mxu1 }
 0x132   : > { %v1673_v52 = vadd.f32 %v2026_v13, %v1658_v38  ;;  %1636 = vst.msk [vmem:[#allocation2 + $0x30] sm:$0xff] %vm294_vm0, %v1627_v50  ;;  %v1656_v54 = vmul.f32 %v3018_v9, %v1641_v58  ;;  %v1625_v39 = vadd.f32 %v1606_v15, %v1509_v41 }
 0x133   : > { %v1644_v55 = vld [vmem:[#allocation2 + $0x18] sm:$0xff]  ;;  %v2248_v27 = vpop.f32.mrf.mxu1 }
 0x134   : > { %v1681_v61 = vmax.f32 %v1673_v52, 0.0  ;;  %v1671_v42 = vadd.f32 %v2026_v13, %v1656_v54  ;;  %1634 = vst.msk [vmem:[#allocation2 + $0x20] sm:$0xff] %vm294_vm0, %v1625_v39  ;;  %v1659_v36 = vmul.f32 %v3018_v9, %v1644_v55  ;;  %v1628_v57 = vadd.f32 %v2248_v27, %v1512_v45 }
 0x135   : > { %v1642_v29 = vld [vmem:[#allocation2 + $0x8] sm:$0xff]  ;;  %v1609_v31 = vpop.f32.mrf.mxu1 }
 0x136   : > { %v1689_v3 = vpack.c.bf16 %v1681_v61, %v1681_v61  ;;  %v1679_v20 = vmax.f32 %v1671_v42, 0.0  ;;  %v1674_v0 = vadd.f32 %v2026_v13, %v1659_v36  ;;  %1637 = vst.msk [vmem:[#allocation2 + $0x38] sm:$0xff] %vm294_vm0, %v1628_v57  ;;  %v1657_v4 = vmul.f32 %v3018_v9, %v1642_v29 }
 0x137   : > { %v1626_v53 = vadd.f32 %v1609_v31, %v1510_v37 }
 0x138   : > { %v1687_v8 = vpack.c.bf16 %v1679_v20, %v1679_v20  ;;  %v1682_v10 = vmax.f32 %v1674_v0, 0.0  ;;  %v1672_v35 = vadd.f32 %v2026_v13, %v1657_v4  ;;  %1698 = vst.msk [vmem:[%s3035_s9 + $0x8] sm:$0xf] %vm1695_vm8, %v1689_v3 }
 0x139   : > { %v1647_v23 = vld [vmem:[#allocation2 + $0x30] sm:$0xff]  ;;  %1635 = vst.msk [vmem:[#allocation2 + $0x28] sm:$0xff] %vm294_vm0, %v1626_v53 }
 0x13a   : > { %v1662_v17 = vmul.f32 %v3018_v9, %v1647_v23  ;;  %v1690_v43 = vpack.c.bf16 %v1682_v10, %v1682_v10  ;;  %v1680_v59 = vmax.f32 %v1672_v35, 0.0  ;;  %1696 = vst.msk [vmem:[%s3035_s9] sm:$0xf] %vm1695_vm8, %v1687_v8 }
 0x13b   : > { %v1645_v44 = vld [vmem:[#allocation2 + $0x20] sm:$0xff] }
 0x13c   : > { %v1677_v60 = vadd.f32 %v2026_v13, %v1662_v17  ;;  %v1660_v11 = vmul.f32 %v3018_v9, %v1645_v44  ;;  %v1688_v32 = vpack.c.bf16 %v1680_v59, %v1680_v59  ;;  %1699 = vst.msk [vmem:[%s3035_s9 + $0xc] sm:$0xf] %vm1695_vm8, %v1690_v43 }
 0x13d   : > { %v1648_v47 = vld [vmem:[#allocation2 + $0x38] sm:$0xff] }
 0x13e   : > { %v1685_v25 = vmax.f32 %v1677_v60, 0.0  ;;  %v1675_v40 = vadd.f32 %v2026_v13, %v1660_v11  ;;  %v1663_v63 = vmul.f32 %v3018_v9, %v1648_v47  ;;  %1697 = vst.msk [vmem:[%s3035_s9 + $0x4] sm:$0xf] %vm1695_vm8, %v1688_v32 }
 0x140   : > { %v1693_v6 = vpack.c.bf16 %v1685_v25, %v1685_v25  ;;  %v1683_v24 = vmax.f32 %v1675_v40, 0.0  ;;  %v1678_v34 = vadd.f32 %v2026_v13, %v1663_v63  ;;  %v1646_v12 = vld [vmem:[#allocation2 + $0x28] sm:$0xff] }
 0x141   : > { %v1661_v7 = vmul.f32 %v3018_v9, %v1646_v12 }
 0x142   : > { %v1691_v14 = vpack.c.bf16 %v1683_v24, %v1683_v24  ;;  %v1686_v62 = vmax.f32 %v1678_v34, 0.0  ;;  %1702 = vst.msk [vmem:[%s3035_s9 + $0x18] sm:$0xf] %vm1695_vm8, %v1693_v6 }
 0x143   : > { %v1676_v48 = vadd.f32 %v2026_v13, %v1661_v7 }
 0x144   : > { %v1694_v2 = vpack.c.bf16 %v1686_v62, %v1686_v62  ;;  %1700 = vst.msk [vmem:[%s3035_s9 + $0x10] sm:$0xf] %vm1695_vm8, %v1691_v14 }
 0x145   : > { %v1684_v46 = vmax.f32 %v1676_v48, 0.0 }
 0x146   : > { %1703 = vst.msk [vmem:[%s3035_s9 + $0x1c] sm:$0xf] %vm1695_vm8, %v1694_v2 }
 0x147   : > { %v1692_v16 = vpack.c.bf16 %v1684_v46, %v1684_v46 }
 0x149   : > { %1701 = vst.msk [vmem:[%s3035_s9 + $0x14] sm:$0xf] %vm1695_vm8, %v1692_v16 }
 0x14a   : > { %2374 = shalt.err (!%p2371_p5)
}
 0x14b   : > { %s2375_s26 = scalar_lea.hbm %s3061_s14, 512  ;;  %s2379_s6 = scalar_lea.hbm %s3118_s4, 1024 }
 0x14c   : > { %p2376_p6 = scmp.ne.s32.totalorder %s3061_s14, %s2375_s26  ;;  %p2380_p10 = scmp.lt.s32.totalorder %s3061_s14, %s3118_s4 }
 0x14d   : > { %p2381_p11 = scmp.lt.s32.totalorder %s2379_s6, %s2375_s26 }
 0x14e   : > { %p2377_p7 = pnand %p2376_p6, %p2508_p4 }
 0x14f   : > { %p2382_p12 = por %p2381_p11, %p2380_p10 }
 0x150   : > { %p2378_p9 = pneg %p2377_p7 }
 0x152   : > { %p2383_p13 = pnand %p2382_p12, %p2378_p9 }
 0x154   : > { %2386 = shalt.err (!%p2383_p13)
}
 0x155   : > { %s2441_s9 = smov 64   ;;  %s2442_s10 = smov 4  }
 0x156   : > { %2258 = dma.vmem_to_hbm [thread:$0]  (%p2508_p4), %s3063_s11, 512, %s3061_s14, %s3069_s18, %s2441_s9, %s2441_s9, %s2442_s10  }
 0x157 PF: > { %p2264_p0 = scmp.ge.s32.totalorder %s2437_s20, 2  ;;  %s1734_s12 = sand.u32 1, %s2417_s15  }
 0x158   : > { %s1735_s13 = scalar_lea.sflag [#allocation4], %s1734_s12 }
 0x159   : > { %p2261_p1 = pnand %p2264_p0, %p2515_p8 }
 0x15b   : > { %p2262_p2 = pneg %p2261_p1 }
 0x15d   : > { %2412 = dma.done.wait (%p2262_p2), %s1735_s13, 512  }
 0x15e   : > { %2414 = vsyncadd (%p2262_p2), %s1735_s13, 4294966784  ;;  %s17_s20 = sadd.s32 1, %s2437_s20   ;;  %s3125_s15 = smov %s2421_s16 }
 0x15f   : > { %p14_p3 = scmp.ge.s32.totalorder %s17_s20, 4   ;;  %s3126_s16 = smov %s2425_s17 }
 0x160   : > { %s3127_s17 = smov %s2521_s28  ;;  %s3128_s18 = smov %s2433_s19 }
 0x161   : > { %s3129_s19 = smov %s3131_s23  ;;  %16 = sbr.rel (!%p14_p3) target bundleno = 4 (0x4), region = 96 }
 0x166   :  { %1740 = vsyncpa [#allocation4], 1 }
 0x167   :  { %1742 = vsyncpa [#allocation4 + $0x1], 1 }

</bundles_post_ra>
